<compile_context>
chip_gen: v7x
topology: tpu7x:2x2x1
jax: 0.10.0
libtpu: 0.0.40
codegen_flags: <defaults>
</compile_context>

<pallas_src>
import jax
import jax.numpy as jnp
from jax import lax
from jax.experimental import pallas as pl
from jax.experimental.pallas import tpu as pltpu


# ---------------------------------------------------------------------------
# Kernels
# ---------------------------------------------------------------------------
def _propagator_kernel(x_ref, w_ref, b_ref, o_ref):
    # y = relu(x @ W^T + b); w_ref is [Nout, K] (PyTorch layout), contract on K.
    y = lax.dot_general(
        x_ref[...], w_ref[...],
        dimension_numbers=(((1,), (1,)), ((), ())),
        preferred_element_type=jnp.float32)
    y = y + b_ref[...]                       # b is [1, Nout_pad], broadcast over rows
    o_ref[...] = jnp.maximum(y, 0.0).astype(o_ref.dtype)


def _propagator_residual_kernel(x_ref, w_ref, b_ref, res_ref, o_ref):
    # y = relu(x @ W^T + b + res)
    y = lax.dot_general(
        x_ref[...], w_ref[...],
        dimension_numbers=(((1,), (1,)), ((), ())),
        preferred_element_type=jnp.float32)
    y = y + b_ref[...] + res_ref[...].astype(jnp.float32)
    o_ref[...] = jnp.maximum(y, 0.0).astype(o_ref.dtype)


# ---------------------------------------------------------------------------
# Wrapper
# ---------------------------------------------------------------------------
def _round_up(v, m):
    return (v + m - 1) // m * m


def _pick_row_tile(n, k, nout_pad, residual, budget_bytes=24 << 20):
    """Largest row tile (multiple of 8, <= 1024) whose double-buffered working
    set (x, out [, res] tiles) plus the resident weight fits the VMEM budget."""
    weight_bytes = 4 * nout_pad * (k + 1)                       # resident W + bias (f32)
    per_row = 4 * (2 * k + (4 if residual else 2) * nout_pad)   # 2x for double-buffering
    tm = (budget_bytes - weight_bytes) // max(per_row, 1)
    tm = min(max(int(tm) // 8 * 8, 8), 1024)
    tm = min(tm, _round_up(n, 8))            # don't over-tile tiny problems
    return max(tm, 8)


def propagator(x, weight, bias, res=None, residual=False):
    """Forward pass of Propagator.

    Args:
      x:      [N, input_size]
      weight: [output_size, input_size]   (PyTorch nn.Linear layout)
      bias:   [output_size]
      res:    optional [N, output_size] residual (required if residual=True)
    Returns:
      [N, output_size]
    """
    n, input_size = x.shape
    output_size, k_w = weight.shape
    assert k_w == input_size
    out_dtype = x.dtype

    # Lane-dense output feature axis (multiple of 128); padded W rows / bias = 0.
    nout_pad = _round_up(output_size, 128)
    tm = _pick_row_tile(n, input_size, nout_pad, residual)
    n_pad = _round_up(n, tm)
    grid = (n_pad // tm,)

    if n_pad != n:
        x = jnp.pad(x, ((0, n_pad - n), (0, 0)))
    if nout_pad != output_size:
        weight = jnp.pad(weight, ((0, nout_pad - output_size), (0, 0)))
        bias = jnp.pad(bias, (0, nout_pad - output_size))
    b2d = bias.reshape(1, nout_pad).astype(jnp.float32)

    # BlockSpecs: x / res / out tiled over rows; W and bias resident across grid.
    x_spec = pl.BlockSpec((tm, input_size), lambda i: (i, 0))
    w_spec = pl.BlockSpec((nout_pad, input_size), lambda i: (0, 0))
    b_spec = pl.BlockSpec((1, nout_pad), lambda i: (0, 0))
    o_spec = pl.BlockSpec((tm, nout_pad), lambda i: (i, 0))
    out_shape = jax.ShapeDtypeStruct((n_pad, nout_pad), out_dtype)

    flops = 2 * n_pad * input_size * nout_pad
    bytes_accessed = 4 * (n_pad * input_size + nout_pad * input_size + nout_pad
                          + (2 if residual else 1) * n_pad * nout_pad)
    cost = pl.CostEstimate(flops=flops, transcendentals=0,
                           bytes_accessed=bytes_accessed)

    # Explicit scoped-VMEM limit: enough for resident W + double-buffered tiles,
    # but capped below v7x's 64 MiB physical VMEM.
    vmem_needed = (4 * nout_pad * (input_size + 1)
                   + 4 * tm * (2 * input_size + (4 if residual else 2) * nout_pad)
                   + (2 << 20))
    vmem_limit = int(min(max(vmem_needed, 32 << 20), 56 << 20))
    params = pltpu.CompilerParams(
        dimension_semantics=("parallel",),     # v7x: shard row-grid across 2 TCs
        vmem_limit_bytes=vmem_limit)

    if residual:
        assert res is not None
        res_p = res
        if n_pad != n or nout_pad != output_size:
            res_p = jnp.pad(res, ((0, n_pad - n), (0, nout_pad - output_size)))
        res_spec = pl.BlockSpec((tm, nout_pad), lambda i: (i, 0))
        out = pl.pallas_call(
            _propagator_residual_kernel,
            out_shape=out_shape,
            grid=grid,
            in_specs=[x_spec, w_spec, b_spec, res_spec],
            out_specs=o_spec,
            compiler_params=params,
            cost_estimate=cost,
        )(x, weight, b2d, res_p)
    else:
        out = pl.pallas_call(
            _propagator_kernel,
            out_shape=out_shape,
            grid=grid,
            in_specs=[x_spec, w_spec, b_spec],
            out_specs=o_spec,
            compiler_params=params,
            cost_estimate=cost,
        )(x, weight, b2d)

    return out[:n, :output_size]


# ---------------------------------------------------------------------------
# Self-test
# ---------------------------------------------------------------------------
if __name__ == "__main__":
    # Small, deterministic example: n_particles=8, input_size=32, output_size=32
    n_particles, input_size, output_size = 8, 32, 32

    key = jax.random.PRNGKey(0)
    kx, kw, kb, kr = jax.random.split(key, 4)

    x = jax.random.normal(kx, (n_particles, input_size), dtype=jnp.float32)
    # Deterministic "Linear" parameters (PyTorch layout [out, in]).
    bound = 1.0 / jnp.sqrt(input_size)
    weight = jax.random.uniform(kw, (output_size, input_size),
                                minval=-bound, maxval=bound, dtype=jnp.float32)
    bias = jax.random.uniform(kb, (output_size,),
                              minval=-bound, maxval=bound, dtype=jnp.float32)
    res = jax.random.normal(kr, (n_particles, output_size), dtype=jnp.float32)

    # residual=False path
    y = propagator(x, weight, bias, residual=False)
    y = jax.block_until_ready(y)

    # residual=True path
    y_res = propagator(x, weight, bias, res=res, residual=True)
    y_res = jax.block_until_ready(y_res)

    # Reference check in plain JAX.
    ref = jnp.maximum(x @ weight.T + bias, 0.0)
    ref_res = jnp.maximum(x @ weight.T + bias + res, 0.0)
    assert y.shape == (n_particles, output_size)
    assert y_res.shape == (n_particles, output_size)
    assert jnp.allclose(y, ref, atol=1e-5), "mismatch (no residual)"
    assert jnp.allclose(y_res, ref_res, atol=1e-5), "mismatch (residual)"

    # Also exercise a larger, non-divisible shape to hit the tiled/padded path.
    n2, k2, o2 = 1000, 256, 200
    k1, k2_, k3, k4 = jax.random.split(jax.random.PRNGKey(1), 4)
    x2 = jax.random.normal(k1, (n2, k2), dtype=jnp.float32)
    w2 = jax.random.normal(k2_, (o2, k2), dtype=jnp.float32) * 0.05
    b2 = jax.random.normal(k3, (o2,), dtype=jnp.float32) * 0.05
    r2 = jax.random.normal(k4, (n2, o2), dtype=jnp.float32)
    y2 = jax.block_until_ready(propagator(x2, w2, b2, res=r2, residual=True))
    ref2 = jnp.maximum(x2 @ w2.T + b2 + r2, 0.0)
    assert jnp.allclose(y2, ref2, atol=1e-3, rtol=1e-3), "mismatch (large tiled)"

    print("KERNEL_OK")
</pallas_src>

<mosaic_0001>
module attributes {stable_mosaic.version = 11 : i64} {
  func.func @_propagator_kernel(%arg0: i32, %arg1: memref<8x32xf32, #tpu.memory_space<vmem>>, %arg2: memref<128x32xf32, #tpu.memory_space<vmem>>, %arg3: memref<1x128xf32, #tpu.memory_space<vmem>>, %arg4: memref<8x128xf32, #tpu.memory_space<vmem>>) attributes {dimension_semantics = [#tpu.dimension_semantics<parallel>], iteration_bounds = array<i64: 1>, scalar_prefetch = 0 : i64, scratch_operands = 0 : i64, tpu.core_type = #tpu.core_type<tc>, window_params = [{transform_indices = @transform_0, window_bounds = array<i64: 8, 32>}, {pipeline_mode = #tpu.pipeline_mode<synchronous>, transform_indices = @transform_1, window_bounds = array<i64: 128, 32>}, {pipeline_mode = #tpu.pipeline_mode<synchronous>, transform_indices = @transform_2, window_bounds = array<i64: 1, 128>}, {transform_indices = @transform_3, window_bounds = array<i64: 8, 128>}]} {
    %c0 = arith.constant 0 : index
    %c0_0 = arith.constant 0 : index
    %0 = vector.load %arg1[%c0, %c0_0] : memref<8x32xf32, #tpu.memory_space<vmem>>, vector<8x32xf32>
    %c0_1 = arith.constant 0 : index
    %c0_2 = arith.constant 0 : index
    %1 = vector.load %arg2[%c0_1, %c0_2] : memref<128x32xf32, #tpu.memory_space<vmem>>, vector<128x32xf32>
    %cst = arith.constant dense<0.000000e+00> : vector<8x128xf32>
    %2 = tpu.matmul %0, %1, %cst {dimension_numbers = #tpu.dot_dimension_numbers<[1], [1], [0], [0], [0, 0, 1, 0], [], []>} : vector<8x32xf32>, vector<128x32xf32>, vector<8x128xf32> -> vector<8x128xf32>
    %c0_3 = arith.constant 0 : index
    %c0_4 = arith.constant 0 : index
    %3 = vector.load %arg3[%c0_3, %c0_4] : memref<1x128xf32, #tpu.memory_space<vmem>>, vector<1x128xf32>
    %4 = vector.broadcast %3 : vector<1x128xf32> to vector<8x128xf32>
    %5 = arith.addf %2, %4 : vector<8x128xf32>
    %cst_5 = arith.constant 0.000000e+00 : f32
    %6 = vector.broadcast %cst_5 : f32 to vector<8x128xf32>
    %7 = arith.maximumf %5, %6 : vector<8x128xf32>
    %c0_6 = arith.constant 0 : index
    %c0_7 = arith.constant 0 : index
    %8 = vector.load %arg4[%c0_6, %c0_7] : memref<8x128xf32, #tpu.memory_space<vmem>>, vector<8x128xf32>
    tpu.vector_store %arg4[%c0_6, %c0_7], %7 {strides = array<i32>} : memref<8x128xf32, #tpu.memory_space<vmem>>, vector<8x128xf32>,
    return
  }
  func.func @transform_0(%arg0: i32) -> (i32, i32) {
    %c0_i32 = arith.constant 0 : i32
    %c0_i32_0 = arith.constant 0 : i32
    return %arg0, %c0_i32 : i32, i32
  }
  func.func @transform_1(%arg0: i32) -> (i32, i32) {
    %c0_i32 = arith.constant 0 : i32
    %c0_i32_0 = arith.constant 0 : i32
    %c0_i32_1 = arith.constant 0 : i32
    return %c0_i32, %c0_i32_0 : i32, i32
  }
  func.func @transform_2(%arg0: i32) -> (i32, i32) {
    %c0_i32 = arith.constant 0 : i32
    %c0_i32_0 = arith.constant 0 : i32
    %c0_i32_1 = arith.constant 0 : i32
    return %c0_i32, %c0_i32_0 : i32, i32
  }
  func.func @transform_3(%arg0: i32) -> (i32, i32) {
    %c0_i32 = arith.constant 0 : i32
    %c0_i32_0 = arith.constant 0 : i32
    return %arg0, %c0_i32 : i32, i32
  }
}

</mosaic_0001>

<bundles_post_ra>
// kernel: tpu_custom_call.1
= control target key start
LH: loop header
LB: loop body
LE: loop exit
PB: predicated region body
PF: predicated region fallthrough
CT: control target
= control target key end

     0   :  { %vm39_vm0 = vcmask 261120   ;;  %v307_v2 = vmov 0.0|0.0   ;;  %vm308_vm2 = vmmov 0   ;;  %v309_v5 = vmov 0.0   ;;  %s420_s0 = inlined_call_operand.vmem [shape: f32[8,32], index: 0, kind: input, shape index: {}]   ;;  %s421_s1 = inlined_call_operand.vmem [shape: f32[128,32], index: 1, kind: input, shape index: {}]   ;;  %s422_s2 = inlined_call_operand.vmem [shape: f32[1,128], index: 2, kind: input, shape index: {}]   ;;  %s423_s3 = inlined_call_operand.hbm [shape: f32[8,128], index: 3, kind: output, shape index: {}]  }
   0x1   :  { %v16_v0 = vld [vmem:[%s421_s1] sm:$0xff]  ;;  %v17_v1 = vld [vmem:[%s421_s1 + $0x8] sm:$0xff]  ;;  %247 = vmatprep.subr.bf16.mxu0 %v307_v2  ;;  %vm339_vm1 = vmpackc.low %vm39_vm0, %vm39_vm0  ;;  %244 = vmatprep.mubr.msk.f32.mxu0 %vm308_vm2, %v309_v5 }
   0x2   :  { %v248_v3 = vpack.c.bf16 %v17_v1, %v16_v0  ;;  %v18_v6 = vld [vmem:[%s421_s1 + $0x10] sm:$0xff]  ;;  %v19_v7 = vld [vmem:[%s421_s1 + $0x18] sm:$0xff] }
   0x4   :  { %250 = vmatpush3.bf16.xpose.msk.msra.mxu0 %vm339_vm1, %v248_v3 }
   0x5   :  { %251 = vmatprep.subr.bf16.mxu0 %v307_v2 }
   0x6   :  { %8 = vsyncpa [#allocation3], 0  ;;  %v252_v8 = vpack.c.bf16 %v19_v7, %v18_v6  ;;  %v20_v9 = vld [vmem:[%s421_s1 + $0x20] sm:$0xff]  ;;  %v21_v10 = vld [vmem:[%s421_s1 + $0x28] sm:$0xff]  ;;  %s310_s21 = smov [#allocation2]  }
   0x7   :  { %v256_v11 = vpack.c.bf16 %v21_v10, %v20_v9  ;;  %v22_v12 = vld [vmem:[%s421_s1 + $0x30] sm:$0xff]  ;;  %v23_v13 = vld [vmem:[%s421_s1 + $0x38] sm:$0xff]  ;;  %v24_v15 = vld [vmem:[%s421_s1 + $0x40] sm:$0xff]  ;;  %s169_s22 = sshll.u32 %s310_s21, 4  ;;  %s170_s22 = int_to_ptr.vmem [resolvable:$true] %s169_s22 }
   0x8   :  { %v260_v14 = vpack.c.bf16 %v23_v13, %v22_v12  ;;  %v25_v16 = vld [vmem:[%s421_s1 + $0x48] sm:$0xff]  ;;  %v26_v18 = vld [vmem:[%s421_s1 + $0x50] sm:$0xff]  ;;  %v27_v19 = vld [vmem:[%s421_s1 + $0x58] sm:$0xff]  ;;  %p288_p1 = scmp.lt.s32.totalorder %s170_s22, %s170_s22 }
   0x9   :  { %v264_v17 = vpack.c.bf16 %v25_v16, %v24_v15  ;;  %v268_v20 = vpack.c.bf16 %v27_v19, %v26_v18  ;;  %v28_v21 = vld [vmem:[%s421_s1 + $0x60] sm:$0xff]  ;;  %v29_v22 = vld [vmem:[%s421_s1 + $0x68] sm:$0xff]  ;;  %v30_v24 = vld [vmem:[%s421_s1 + $0x70] sm:$0xff] }
   0xa   :  { %v272_v23 = vpack.c.bf16 %v29_v22, %v28_v21  ;;  %v31_v25 = vld [vmem:[%s421_s1 + $0x78] sm:$0xff]  ;;  %v15_v27 = vld [vmem:[%s420_s0] sm:$0xff]  ;;  %s283_s1 = scalar_lea.vmem %s170_s22, 128 }
   0xb   :  { %v276_v26 = vpack.c.bf16 %v31_v25, %v30_v24  ;;  %v177_v28 = vld [vmem:[%s422_s2] ss:$0 sm:$0xff]  ;;  %p284_p0 = scmp.ne.s32.totalorder %s170_s22, %s283_s1  ;;  %p289_p2 = scmp.lt.s32.totalorder %s283_s1, %s283_s1 }
   0xc   :  { %254 = vmatpush3.bf16.xpose.msk.msra.mxu0 %vm339_vm1, %v252_v8 }
   0xd   :  { %255 = vmatprep.subr.bf16.mxu0 %v307_v2  ;;  %p290_p3 = por %p289_p2, %p288_p1 }
   0xf   :  { %p291_p4 = pnand %p290_p3, %p284_p0 }
  0x14   :  { %258 = vmatpush3.bf16.xpose.msk.msra.mxu0 %vm339_vm1, %v256_v11 }
  0x15   :  { %259 = vmatprep.subr.bf16.mxu0 %v307_v2 }
  0x1c   :  { %262 = vmatpush3.bf16.xpose.msk.msra.mxu0 %vm339_vm1, %v260_v14 }
  0x1d   :  { %263 = vmatprep.subr.bf16.mxu0 %v307_v2 }
  0x24   :  { %266 = vmatpush3.bf16.xpose.msk.msra.mxu0 %vm339_vm1, %v264_v17 }
  0x25   :  { %267 = vmatprep.subr.bf16.mxu0 %v307_v2 }
  0x2c   :  { %270 = vmatpush3.bf16.xpose.msk.msra.mxu0 %vm339_vm1, %v268_v20 }
  0x2d   :  { %271 = vmatprep.subr.bf16.mxu0 %v307_v2 }
  0x34   :  { %274 = vmatpush3.bf16.xpose.msk.msra.mxu0 %vm339_vm1, %v272_v23 }
  0x35   :  { %275 = vmatprep.subr.bf16.mxu0 %v307_v2 }
  0x3c   :  { %278 = vmatpush3.bf16.xpose.msk.msra.mxu0 %vm339_vm1, %v276_v26 }
  0x43   :  { %245 = vmatmul.mubr.msk.f32.vlgmr.msra.gmra.mrb[0].mxu0 %vm39_vm0, %v15_v27 }
 0x116   :  { %v157_v29 = vpop.f32.mrb[0].mxu0 }
 0x117   :  { %v158_v30 = vadd.f32 %v177_v28, %v157_v29  ;;  %v246_v31 = vpop.f32.mrb[1].mxu0 }
 0x119   :  { %v161_v32 = vmax.f32 %v158_v30, 0.0 }
 0x11b   :  { %162 = vst [vmem:[#allocation2] sm:$0xff] %v161_v32 }
 0x11c   :  { %294 = shalt.err (!%p291_p4)
}
 0x11d   :  { %s295_s24 = scalar_lea.hbm %s423_s3, 128 }
 0x11e   :  { %p296_p5 = scmp.ne.s32.totalorder %s423_s3, %s295_s24  ;;  %p299_p6 = scmp.lt.u32.totalorder %s295_s24, %s423_s3 }
 0x120   :  { %p301_p7 = pnand %p299_p6, %p296_p5 }
 0x122   :  { %304 = shalt.err (!%p301_p7)
}
 0x123   :  { %172 = dma.vmem_to_hbm [thread:$0]  %s170_s22, 128, %s423_s3, [#allocation3]  }
 0x124   :  { %305 = dma.done.wait [#allocation3], 128  }
 0x125   :  { %306 = vsyncadd [#allocation3], 4294967168 }
 0x126   :  { %176 = vsyncpa [#allocation3], 1 }

</bundles_post_ra>
